<compile_context>
chip_gen: v7x
topology: tpu7x:2x2x1
jax: 0.10.0
libtpu: 0.0.40
codegen_flags: <defaults>
</compile_context>

<pallas_src>
import jax
import jax.numpy as jnp
from jax import lax
from jax.experimental import pallas as pl
from jax.experimental.pallas import tpu as pltpu


def gru_chunk_kernel(x_ref, wih_ref, whh_ref, bih_ref, bhh_ref,
                     out_ref, h_scr, xp_scr):
    """One time-chunk of the GRU.

    x_ref   : (Tc, B_pad, H_pad)   bf16  embedded inputs for this chunk
    wih_ref : (H_pad, 3*H_pad)     bf16  fused input->gate weights (r, z, n)
    whh_ref : (H_pad, 3*H_pad)     bf16  fused hidden->gate weights
    bih_ref : (1, 3*H_pad)         f32   input biases
    bhh_ref : (1, 3*H_pad)         f32   hidden biases
    out_ref : (Tc, B_pad, H_pad)   f32   per-step hidden states (this chunk)
    h_scr   : (B_pad, H_pad)       f32   hidden-state carry across grid steps
    xp_scr  : (Tc, B_pad, 3*H_pad) f32   hoisted input projections (chunk)
    """
    Tc, B_pad, H_pad = out_ref.shape

    # Zero the carried hidden state on the first chunk only.
    @pl.when(pl.program_id(0) == 0)
    def _():
        h_scr[...] = jnp.zeros_like(h_scr)

    # ---- Phase 1: non-recurrent input projection (one big MXU matmul). ----
    x_flat = x_ref[...].reshape(Tc * B_pad, H_pad)              # tile-aligned view
    xp = jnp.dot(x_flat, wih_ref[...],
                 preferred_element_type=jnp.float32) + bih_ref[...]
    xp_scr[...] = xp.reshape(Tc, B_pad, 3 * H_pad)

    # ---- Phase 2: serial recurrence (only h-dependent work on the path). ----
    whh = whh_ref[...]            # loop-invariant; load once (bf16)
    bhh = bhh_ref[...]            # (1, 3*H_pad) f32

    def step(t, carry):
        h_prev = h_scr[...]                                      # (B_pad, H_pad) f32
        xp_t = xp_scr[t]                                         # (B_pad, 3*H_pad) view
        hp = jnp.dot(h_prev.astype(jnp.bfloat16), whh,
                     preferred_element_type=jnp.float32) + bhh   # (B_pad, 3*H_pad)

        # 128-aligned static gate slices -> free views.
        r = jax.nn.sigmoid(xp_t[:, 0:H_pad] + hp[:, 0:H_pad])
        z = jax.nn.sigmoid(xp_t[:, H_pad:2 * H_pad] + hp[:, H_pad:2 * H_pad])
        n = jnp.tanh(xp_t[:, 2 * H_pad:3 * H_pad]
                     + r * hp[:, 2 * H_pad:3 * H_pad])
        h_new = n + z * (h_prev - n)                             # == (1-z)*n + z*h

        h_scr[...] = h_new
        out_ref[t] = h_new.astype(out_ref.dtype)                 # lane-dense store
        return carry

    lax.fori_loop(0, Tc, step, 0, unroll=4)


def gru_pallas(x_pad, w_ih_cat, w_hh_cat, b_ih_cat, b_hh_cat, Tc):
    """x_pad: (T_pad, B_pad, H_pad) bf16. Returns (T_pad, B_pad, H_pad) f32."""
    T_pad, B_pad, H_pad = x_pad.shape
    n_chunks = T_pad // Tc
    grid_spec = pltpu.PrefetchScalarGridSpec(
        num_scalar_prefetch=0,
        grid=(n_chunks,),
        in_specs=[
            pl.BlockSpec((Tc, B_pad, H_pad), lambda t: (t, 0, 0)),       # x chunk
            pl.BlockSpec((H_pad, 3 * H_pad), lambda t: (0, 0)),          # W_ih
            pl.BlockSpec((H_pad, 3 * H_pad), lambda t: (0, 0)),          # W_hh
            pl.BlockSpec((1, 3 * H_pad), lambda t: (0, 0)),              # b_ih
            pl.BlockSpec((1, 3 * H_pad), lambda t: (0, 0)),              # b_hh
        ],
        out_specs=pl.BlockSpec((Tc, B_pad, H_pad), lambda t: (t, 0, 0)),
        scratch_shapes=[
            pltpu.VMEM((B_pad, H_pad), jnp.float32),           # hidden-state carry
            pltpu.VMEM((Tc, B_pad, 3 * H_pad), jnp.float32),   # chunk x-projections
        ],
    )
    return pl.pallas_call(
        gru_chunk_kernel,
        out_shape=jax.ShapeDtypeStruct((T_pad, B_pad, H_pad), jnp.float32),
        grid_spec=grid_spec,
        compiler_params=pltpu.CompilerParams(
            # The recurrence carries h across grid steps -> serial grid axis.
            dimension_semantics=("arbitrary",)),
    )(x_pad, w_ih_cat, w_hh_cat, b_ih_cat, b_hh_cat)


def _round_up(v, m):
    return ((v + m - 1) // m) * m


def encoder_rnn_forward(input_seq, emb_table, w_ih, w_hh, b_ih, b_hh,
                        time_chunk=4):
    """input_seq: (B, T) int32 token ids.

    w_ih, w_hh: (3, H, H) pre-transposed PyTorch gate blocks (x @ W[g]),
                gate order (r, z, n).
    b_ih, b_hh: (3, 1, H).
    Returns (output (B, T, H), hidden (1, B, H)) matching PyTorch's
    batch_first GRU with num_layers=1 (eval-mode dropout).
    """
    B, T = input_seq.shape
    H = emb_table.shape[1]

    # Lane/sublane padding for dense vregs and unmasked stores.
    H_pad = _round_up(max(H, 128), 128)
    B_pad = _round_up(max(B, 8), 8)
    Tc = min(time_chunk, T)
    T_pad = _round_up(T, Tc)

    # Embedding gather, time-major at the token level (transposing (B,T) ids is
    # essentially free vs. transposing the (B,T,H) embedded tensor).
    # TODO(synk): nn.Dropout is stochastic in train mode; applied as eval-mode
    # identity here (in-kernel pltpu.prng_* would be needed for train parity).
    embedded_tm = jnp.take(emb_table, input_seq.T, axis=0)        # (T, B, H) f32

    # Zero-padded, bf16 MXU operand for x.
    x_pad = jnp.zeros((T_pad, B_pad, H_pad), jnp.bfloat16)
    x_pad = x_pad.at[:T, :B, :H].set(embedded_tm.astype(jnp.bfloat16))

    # Fused, padded gate slabs: gate g lives at 128-aligned columns
    # [g*H_pad, g*H_pad + H); padding is zero so padded lanes stay zero.
    def fuse_pad_w(w):
        out = jnp.zeros((H_pad, 3 * H_pad), jnp.bfloat16)
        for g in range(3):
            out = out.at[:H, g * H_pad:g * H_pad + H].set(w[g].astype(jnp.bfloat16))
        return out

    def fuse_pad_b(b):
        out = jnp.zeros((1, 3 * H_pad), jnp.float32)
        for g in range(3):
            out = out.at[0, g * H_pad:g * H_pad + H].set(b[g, 0])
        return out

    w_ih_cat = fuse_pad_w(w_ih)
    w_hh_cat = fuse_pad_w(w_hh)
    b_ih_cat = fuse_pad_b(b_ih)
    b_hh_cat = fuse_pad_b(b_hh)

    out_tm = gru_pallas(x_pad, w_ih_cat, w_hh_cat, b_ih_cat, b_hh_cat, Tc)

    output = jnp.transpose(out_tm[:T, :B, :H], (1, 0, 2))          # (B, T, H)
    hidden = out_tm[T - 1, :B, :H][None, :, :]                     # (1, B, H)
    return output, hidden


def gru_reference(x_tm, w_ih, w_hh, b_ih, b_hh):
    """Pure-JAX f32 reference of the same GRU for a correctness check."""
    B, H = x_tm.shape[1], x_tm.shape[2]

    def step(h, x):
        i_r = x @ w_ih[0] + b_ih[0]
        i_z = x @ w_ih[1] + b_ih[1]
        i_n = x @ w_ih[2] + b_ih[2]
        h_r = h @ w_hh[0] + b_hh[0]
        h_z = h @ w_hh[1] + b_hh[1]
        h_n = h @ w_hh[2] + b_hh[2]
        r = jax.nn.sigmoid(i_r + h_r)
        z = jax.nn.sigmoid(i_z + h_z)
        n = jnp.tanh(i_n + r * h_n)
        h_new = (1.0 - z) * n + z * h
        return h_new, h_new

    h0 = jnp.zeros((B, H), jnp.float32)
    hT, ys = lax.scan(step, h0, x_tm)
    return ys, hT


if __name__ == "__main__":
    # Small shapes consistent with the module's forward.
    INPUT_DIM = 50      # vocab size
    HIDDEN = 32         # hidden_dim
    BATCH = 2
    SEQ = 8

    key = jax.random.PRNGKey(0)
    k_emb, k_wih, k_whh, k_bih, k_bhh, k_tok = jax.random.split(key, 6)

    # Deterministic parameter init (PyTorch-style ranges).
    emb_table = jax.random.normal(k_emb, (INPUT_DIM, HIDDEN), jnp.float32)
    bound = 1.0 / jnp.sqrt(HIDDEN)
    # Gate weights laid out as (3, H_in, H_out) = transposed PyTorch blocks.
    w_ih = jax.random.uniform(k_wih, (3, HIDDEN, HIDDEN), jnp.float32, -bound, bound)
    w_hh = jax.random.uniform(k_whh, (3, HIDDEN, HIDDEN), jnp.float32, -bound, bound)
    b_ih = jax.random.uniform(k_bih, (3, 1, HIDDEN), jnp.float32, -bound, bound)
    b_hh = jax.random.uniform(k_bhh, (3, 1, HIDDEN), jnp.float32, -bound, bound)

    input_seq = jax.random.randint(k_tok, (BATCH, SEQ), 0, INPUT_DIM, jnp.int32)

    output, hidden = encoder_rnn_forward(input_seq, emb_table, w_ih, w_hh,
                                         b_ih, b_hh, time_chunk=4)
    output = jax.block_until_ready(output)
    hidden = jax.block_until_ready(hidden)

    # Correctness check against a pure-JAX f32 reference.  The kernel feeds
    # bf16 operands to the MXU (f32 accumulation), so the tolerance is bf16-level.
    embedded = jnp.take(emb_table, input_seq, axis=0)
    x_tm = jnp.transpose(embedded, (1, 0, 2))
    ref_out_tm, ref_hT = gru_reference(x_tm, w_ih, w_hh, b_ih, b_hh)
    ref_output = jnp.transpose(ref_out_tm, (1, 0, 2))

    assert output.shape == (BATCH, SEQ, HIDDEN)
    assert hidden.shape == (1, BATCH, HIDDEN)
    assert jnp.allclose(output, ref_output, rtol=3e-2, atol=3e-2), (
        float(jnp.max(jnp.abs(output - ref_output))))
    assert jnp.allclose(hidden[0], ref_hT, rtol=3e-2, atol=3e-2)

    print("KERNEL_OK")
</pallas_src>

<mosaic_0001>
module attributes {stable_mosaic.version = 11 : i64} {
  func.func @gru_chunk_kernel(%arg0: i32, %arg1: memref<4x8x128xbf16, #tpu.memory_space<vmem>>, %arg2: memref<128x384xbf16, #tpu.memory_space<vmem>>, %arg3: memref<128x384xbf16, #tpu.memory_space<vmem>>, %arg4: memref<1x384xf32, #tpu.memory_space<vmem>>, %arg5: memref<1x384xf32, #tpu.memory_space<vmem>>, %arg6: memref<4x8x128xf32, #tpu.memory_space<vmem>>, %arg7: memref<8x128xf32, #tpu.memory_space<vmem>>, %arg8: memref<4x8x384xf32, #tpu.memory_space<vmem>>) attributes {dimension_semantics = [#tpu.dimension_semantics<arbitrary>], iteration_bounds = array<i64: 2>, scalar_prefetch = 0 : i64, scratch_operands = 2 : i64, tpu.core_type = #tpu.core_type<tc>, window_params = [{transform_indices = @transform_0, window_bounds = array<i64: 4, 8, 128>}, {pipeline_mode = #tpu.pipeline_mode<synchronous>, transform_indices = @transform_1, window_bounds = array<i64: 128, 384>}, {pipeline_mode = #tpu.pipeline_mode<synchronous>, transform_indices = @transform_2, window_bounds = array<i64: 128, 384>}, {pipeline_mode = #tpu.pipeline_mode<synchronous>, transform_indices = @transform_3, window_bounds = array<i64: 1, 384>}, {pipeline_mode = #tpu.pipeline_mode<synchronous>, transform_indices = @transform_4, window_bounds = array<i64: 1, 384>}, {transform_indices = @transform_5, window_bounds = array<i64: 4, 8, 128>}]} {
    %c0_i32 = arith.constant 0 : i32
    %0 = arith.cmpi eq, %arg0, %c0_i32 : i32
    %1 = arith.extui %0 : i1 to i32
    %c0_i32_0 = arith.constant 0 : i32
    %2 = arith.cmpi ne, %1, %c0_i32_0 : i32
    scf.if %2 {
      %cst_59 = arith.constant 0.000000e+00 : f32
      %162 = vector.broadcast %cst_59 : f32 to vector<8x128xf32>
      %c0_60 = arith.constant 0 : index
      %c0_61 = arith.constant 0 : index
      %163 = vector.load %arg7[%c0_60, %c0_61] : memref<8x128xf32, #tpu.memory_space<vmem>>, vector<8x128xf32>
      tpu.vector_store %arg7[%c0_60, %c0_61], %162 {strides = array<i32>} : memref<8x128xf32, #tpu.memory_space<vmem>>, vector<8x128xf32>,
    } else {
    }
    %c0 = arith.constant 0 : index
    %c0_1 = arith.constant 0 : index
    %c0_2 = arith.constant 0 : index
    %3 = vector.load %arg1[%c0, %c0_1, %c0_2] : memref<4x8x128xbf16, #tpu.memory_space<vmem>>, vector<4x8x128xbf16>
    %4 = vector.shape_cast %3 : vector<4x8x128xbf16> to vector<32x128xbf16>
    %c0_3 = arith.constant 0 : index
    %c0_4 = arith.constant 0 : index
    %5 = vector.load %arg2[%c0_3, %c0_4] : memref<128x384xbf16, #tpu.memory_space<vmem>>, vector<128x384xbf16>
    %cst = arith.constant dense<0.000000e+00> : vector<32x384xf32>
    %6 = tpu.matmul %4, %5, %cst {dimension_numbers = #tpu.dot_dimension_numbers<[1], [0], [0], [1], [0, 0, 1, 1], [], []>} : vector<32x128xbf16>, vector<128x384xbf16>, vector<32x384xf32> -> vector<32x384xf32>
    %c0_5 = arith.constant 0 : index
    %c0_6 = arith.constant 0 : index
    %7 = vector.load %arg4[%c0_5, %c0_6] : memref<1x384xf32, #tpu.memory_space<vmem>>, vector<1x384xf32>
    %8 = vector.broadcast %7 : vector<1x384xf32> to vector<32x384xf32>
    %9 = arith.addf %6, %8 : vector<32x384xf32>
    %10 = vector.shape_cast %9 : vector<32x384xf32> to vector<4x8x384xf32>
    %c0_7 = arith.constant 0 : index
    %c0_8 = arith.constant 0 : index
    %c0_9 = arith.constant 0 : index
    %11 = vector.load %arg8[%c0_7, %c0_8, %c0_9] : memref<4x8x384xf32, #tpu.memory_space<vmem>>, vector<4x8x384xf32>
    tpu.vector_store %arg8[%c0_7, %c0_8, %c0_9], %10 {strides = array<i32>} : memref<4x8x384xf32, #tpu.memory_space<vmem>>, vector<4x8x384xf32>,
    %c0_10 = arith.constant 0 : index
    %c0_11 = arith.constant 0 : index
    %12 = vector.load %arg3[%c0_10, %c0_11] : memref<128x384xbf16, #tpu.memory_space<vmem>>, vector<128x384xbf16>
    %c0_12 = arith.constant 0 : index
    %c0_13 = arith.constant 0 : index
    %13 = vector.load %arg5[%c0_12, %c0_13] : memref<1x384xf32, #tpu.memory_space<vmem>>, vector<1x384xf32>
    %c0_i32_14 = arith.constant 0 : i32
    %c0_15 = arith.constant 0 : index
    %c0_16 = arith.constant 0 : index
    %14 = vector.load %arg7[%c0_15, %c0_16] : memref<8x128xf32, #tpu.memory_space<vmem>>, vector<8x128xf32>
    %15 = arith.index_cast %c0_i32_14 : i32 to index
    %c0_17 = arith.constant 0 : index
    %c0_18 = arith.constant 0 : index
    %16 = vector.load %arg8[%15, %c0_17, %c0_18] : memref<4x8x384xf32, #tpu.memory_space<vmem>>, vector<1x8x384xf32>
    %17 = vector.shape_cast %16 : vector<1x8x384xf32> to vector<8x384xf32>
    %18 = arith.truncf %14 : vector<8x128xf32> to vector<8x128xbf16>
    %cst_19 = arith.constant dense<0.000000e+00> : vector<8x384xf32>
    %19 = tpu.matmul %18, %12, %cst_19 {dimension_numbers = #tpu.dot_dimension_numbers<[1], [0], [0], [1], [0, 0, 1, 1], [], []>} : vector<8x128xbf16>, vector<128x384xbf16>, vector<8x384xf32> -> vector<8x384xf32>
    %20 = vector.broadcast %13 : vector<1x384xf32> to vector<8x384xf32>
    %21 = arith.addf %19, %20 : vector<8x384xf32>
    %22 = vector.extract_strided_slice %17 {offsets = [0, 0], sizes = [8, 128], strides = [1, 1]} : vector<8x384xf32> to vector<8x128xf32>
    %23 = vector.extract_strided_slice %21 {offsets = [0, 0], sizes = [8, 128], strides = [1, 1]} : vector<8x384xf32> to vector<8x128xf32>
    %24 = arith.addf %22, %23 : vector<8x128xf32>
    %25 = arith.negf %24 : vector<8x128xf32>
    %26 = math.exp %25 : vector<8x128xf32>
    %cst_20 = arith.constant 1.000000e+00 : f32
    %27 = vector.broadcast %cst_20 : f32 to vector<8x128xf32>
    %28 = arith.addf %27, %26 : vector<8x128xf32>
    %29 = arith.divf %27, %28 : vector<8x128xf32>
    %30 = vector.extract_strided_slice %17 {offsets = [0, 128], sizes = [8, 128], strides = [1, 1]} : vector<8x384xf32> to vector<8x128xf32>
    %31 = vector.extract_strided_slice %21 {offsets = [0, 128], sizes = [8, 128], strides = [1, 1]} : vector<8x384xf32> to vector<8x128xf32>
    %32 = arith.addf %30, %31 : vector<8x128xf32>
    %33 = arith.negf %32 : vector<8x128xf32>
    %34 = math.exp %33 : vector<8x128xf32>
    %cst_21 = arith.constant 1.000000e+00 : f32
    %35 = vector.broadcast %cst_21 : f32 to vector<8x128xf32>
    %36 = arith.addf %35, %34 : vector<8x128xf32>
    %37 = arith.divf %35, %36 : vector<8x128xf32>
    %38 = vector.extract_strided_slice %17 {offsets = [0, 256], sizes = [8, 128], strides = [1, 1]} : vector<8x384xf32> to vector<8x128xf32>
    %39 = vector.extract_strided_slice %21 {offsets = [0, 256], sizes = [8, 128], strides = [1, 1]} : vector<8x384xf32> to vector<8x128xf32>
    %40 = arith.mulf %29, %39 : vector<8x128xf32>
    %41 = arith.addf %38, %40 : vector<8x128xf32>
    %42 = math.tanh %41 : vector<8x128xf32>
    %43 = arith.subf %14, %42 : vector<8x128xf32>
    %44 = arith.mulf %37, %43 : vector<8x128xf32>
    %45 = arith.addf %42, %44 : vector<8x128xf32>
    %c0_22 = arith.constant 0 : index
    %c0_23 = arith.constant 0 : index
    %46 = vector.load %arg7[%c0_22, %c0_23] : memref<8x128xf32, #tpu.memory_space<vmem>>, vector<8x128xf32>
    tpu.vector_store %arg7[%c0_22, %c0_23], %45 {strides = array<i32>} : memref<8x128xf32, #tpu.memory_space<vmem>>, vector<8x128xf32>,
    %47 = arith.index_cast %c0_i32_14 : i32 to index
    %c0_24 = arith.constant 0 : index
    %c0_25 = arith.constant 0 : index
    %48 = vector.load %arg6[%47, %c0_24, %c0_25] : memref<4x8x128xf32, #tpu.memory_space<vmem>>, vector<1x8x128xf32>
    %49 = vector.shape_cast %48 : vector<1x8x128xf32> to vector<8x128xf32>
    %50 = vector.shape_cast %45 : vector<8x128xf32> to vector<1x8x128xf32>
    tpu.vector_store %arg6[%47, %c0_24, %c0_25], %50 {strides = array<i32>} : memref<4x8x128xf32, #tpu.memory_space<vmem>>, vector<1x8x128xf32>,
    %c1_i32 = arith.constant 1 : i32
    %c0_26 = arith.constant 0 : index
    %c0_27 = arith.constant 0 : index
    %51 = vector.load %arg7[%c0_26, %c0_27] : memref<8x128xf32, #tpu.memory_space<vmem>>, vector<8x128xf32>
    %52 = arith.index_cast %c1_i32 : i32 to index
    %c0_28 = arith.constant 0 : index
    %c0_29 = arith.constant 0 : index
    %53 = vector.load %arg8[%52, %c0_28, %c0_29] : memref<4x8x384xf32, #tpu.memory_space<vmem>>, vector<1x8x384xf32>
    %54 = vector.shape_cast %53 : vector<1x8x384xf32> to vector<8x384xf32>
    %55 = arith.truncf %51 : vector<8x128xf32> to vector<8x128xbf16>
    %cst_30 = arith.constant dense<0.000000e+00> : vector<8x384xf32>
    %56 = tpu.matmul %55, %12, %cst_30 {dimension_numbers = #tpu.dot_dimension_numbers<[1], [0], [0], [1], [0, 0, 1, 1], [], []>} : vector<8x128xbf16>, vector<128x384xbf16>, vector<8x384xf32> -> vector<8x384xf32>
    %57 = vector.broadcast %13 : vector<1x384xf32> to vector<8x384xf32>
    %58 = arith.addf %56, %57 : vector<8x384xf32>
    %59 = vector.extract_strided_slice %54 {offsets = [0, 0], sizes = [8, 128], strides = [1, 1]} : vector<8x384xf32> to vector<8x128xf32>
    %60 = vector.extract_strided_slice %58 {offsets = [0, 0], sizes = [8, 128], strides = [1, 1]} : vector<8x384xf32> to vector<8x128xf32>
    %61 = arith.addf %59, %60 : vector<8x128xf32>
    %62 = arith.negf %61 : vector<8x128xf32>
    %63 = math.exp %62 : vector<8x128xf32>
    %cst_31 = arith.constant 1.000000e+00 : f32
    %64 = vector.broadcast %cst_31 : f32 to vector<8x128xf32>
    %65 = arith.addf %64, %63 : vector<8x128xf32>
    %66 = arith.divf %64, %65 : vector<8x128xf32>
    %67 = vector.extract_strided_slice %54 {offsets = [0, 128], sizes = [8, 128], strides = [1, 1]} : vector<8x384xf32> to vector<8x128xf32>
    %68 = vector.extract_strided_slice %58 {offsets = [0, 128], sizes = [8, 128], strides = [1, 1]} : vector<8x384xf32> to vector<8x128xf32>
    %69 = arith.addf %67, %68 : vector<8x128xf32>
    %70 = arith.negf %69 : vector<8x128xf32>
    %71 = math.exp %70 : vector<8x128xf32>
    %cst_32 = arith.constant 1.000000e+00 : f32
    %72 = vector.broadcast %cst_32 : f32 to vector<8x128xf32>
    %73 = arith.addf %72, %71 : vector<8x128xf32>
    %74 = arith.divf %72, %73 : vector<8x128xf32>
    %75 = vector.extract_strided_slice %54 {offsets = [0, 256], sizes = [8, 128], strides = [1, 1]} : vector<8x384xf32> to vector<8x128xf32>
    %76 = vector.extract_strided_slice %58 {offsets = [0, 256], sizes = [8, 128], strides = [1, 1]} : vector<8x384xf32> to vector<8x128xf32>
    %77 = arith.mulf %66, %76 : vector<8x128xf32>
    %78 = arith.addf %75, %77 : vector<8x128xf32>
    %79 = math.tanh %78 : vector<8x128xf32>
    %80 = arith.subf %51, %79 : vector<8x128xf32>
    %81 = arith.mulf %74, %80 : vector<8x128xf32>
    %82 = arith.addf %79, %81 : vector<8x128xf32>
    %c0_33 = arith.constant 0 : index
    %c0_34 = arith.constant 0 : index
    %83 = vector.load %arg7[%c0_33, %c0_34] : memref<8x128xf32, #tpu.memory_space<vmem>>, vector<8x128xf32>
    tpu.vector_store %arg7[%c0_33, %c0_34], %82 {strides = array<i32>} : memref<8x128xf32, #tpu.memory_space<vmem>>, vector<8x128xf32>,
    %84 = arith.index_cast %c1_i32 : i32 to index
    %c0_35 = arith.constant 0 : index
    %c0_36 = arith.constant 0 : index
    %85 = vector.load %arg6[%84, %c0_35, %c0_36] : memref<4x8x128xf32, #tpu.memory_space<vmem>>, vector<1x8x128xf32>
    %86 = vector.shape_cast %85 : vector<1x8x128xf32> to vector<8x128xf32>
    %87 = vector.shape_cast %82 : vector<8x128xf32> to vector<1x8x128xf32>
    tpu.vector_store %arg6[%84, %c0_35, %c0_36], %87 {strides = array<i32>} : memref<4x8x128xf32, #tpu.memory_space<vmem>>, vector<1x8x128xf32>,
    %c2_i32 = arith.constant 2 : i32
    %c0_37 = arith.constant 0 : index
    %c0_38 = arith.constant 0 : index
    %88 = vector.load %arg7[%c0_37, %c0_38] : memref<8x128xf32, #tpu.memory_space<vmem>>, vector<8x128xf32>
    %89 = arith.index_cast %c2_i32 : i32 to index
    %c0_39 = arith.constant 0 : index
    %c0_40 = arith.constant 0 : index
    %90 = vector.load %arg8[%89, %c0_39, %c0_40] : memref<4x8x384xf32, #tpu.memory_space<vmem>>, vector<1x8x384xf32>
    %91 = vector.shape_cast %90 : vector<1x8x384xf32> to vector<8x384xf32>
    %92 = arith.truncf %88 : vector<8x128xf32> to vector<8x128xbf16>
    %cst_41 = arith.constant dense<0.000000e+00> : vector<8x384xf32>
    %93 = tpu.matmul %92, %12, %cst_41 {dimension_numbers = #tpu.dot_dimension_numbers<[1], [0], [0], [1], [0, 0, 1, 1], [], []>} : vector<8x128xbf16>, vector<128x384xbf16>, vector<8x384xf32> -> vector<8x384xf32>
    %94 = vector.broadcast %13 : vector<1x384xf32> to vector<8x384xf32>
    %95 = arith.addf %93, %94 : vector<8x384xf32>
    %96 = vector.extract_strided_slice %91 {offsets = [0, 0], sizes = [8, 128], strides = [1, 1]} : vector<8x384xf32> to vector<8x128xf32>
    %97 = vector.extract_strided_slice %95 {offsets = [0, 0], sizes = [8, 128], strides = [1, 1]} : vector<8x384xf32> to vector<8x128xf32>
    %98 = arith.addf %96, %97 : vector<8x128xf32>
    %99 = arith.negf %98 : vector<8x128xf32>
    %100 = math.exp %99 : vector<8x128xf32>
    %cst_42 = arith.constant 1.000000e+00 : f32
    %101 = vector.broadcast %cst_42 : f32 to vector<8x128xf32>
    %102 = arith.addf %101, %100 : vector<8x128xf32>
    %103 = arith.divf %101, %102 : vector<8x128xf32>
    %104 = vector.extract_strided_slice %91 {offsets = [0, 128], sizes = [8, 128], strides = [1, 1]} : vector<8x384xf32> to vector<8x128xf32>
    %105 = vector.extract_strided_slice %95 {offsets = [0, 128], sizes = [8, 128], strides = [1, 1]} : vector<8x384xf32> to vector<8x128xf32>
    %106 = arith.addf %104, %105 : vector<8x128xf32>
    %107 = arith.negf %106 : vector<8x128xf32>
    %108 = math.exp %107 : vector<8x128xf32>
    %cst_43 = arith.constant 1.000000e+00 : f32
    %109 = vector.broadcast %cst_43 : f32 to vector<8x128xf32>
    %110 = arith.addf %109, %108 : vector<8x128xf32>
    %111 = arith.divf %109, %110 : vector<8x128xf32>
    %112 = vector.extract_strided_slice %91 {offsets = [0, 256], sizes = [8, 128], strides = [1, 1]} : vector<8x384xf32> to vector<8x128xf32>
    %113 = vector.extract_strided_slice %95 {offsets = [0, 256], sizes = [8, 128], strides = [1, 1]} : vector<8x384xf32> to vector<8x128xf32>
    %114 = arith.mulf %103, %113 : vector<8x128xf32>
    %115 = arith.addf %112, %114 : vector<8x128xf32>
    %116 = math.tanh %115 : vector<8x128xf32>
    %117 = arith.subf %88, %116 : vector<8x128xf32>
    %118 = arith.mulf %111, %117 : vector<8x128xf32>
    %119 = arith.addf %116, %118 : vector<8x128xf32>
    %c0_44 = arith.constant 0 : index
    %c0_45 = arith.constant 0 : index
    %120 = vector.load %arg7[%c0_44, %c0_45] : memref<8x128xf32, #tpu.memory_space<vmem>>, vector<8x128xf32>
    tpu.vector_store %arg7[%c0_44, %c0_45], %119 {strides = array<i32>} : memref<8x128xf32, #tpu.memory_space<vmem>>, vector<8x128xf32>,
    %121 = arith.index_cast %c2_i32 : i32 to index
    %c0_46 = arith.constant 0 : index
    %c0_47 = arith.constant 0 : index
    %122 = vector.load %arg6[%121, %c0_46, %c0_47] : memref<4x8x128xf32, #tpu.memory_space<vmem>>, vector<1x8x128xf32>
    %123 = vector.shape_cast %122 : vector<1x8x128xf32> to vector<8x128xf32>
    %124 = vector.shape_cast %119 : vector<8x128xf32> to vector<1x8x128xf32>
    tpu.vector_store %arg6[%121, %c0_46, %c0_47], %124 {strides = array<i32>} : memref<4x8x128xf32, #tpu.memory_space<vmem>>, vector<1x8x128xf32>,
    %c3_i32 = arith.constant 3 : i32
    %c0_48 = arith.constant 0 : index
    %c0_49 = arith.constant 0 : index
    %125 = vector.load %arg7[%c0_48, %c0_49] : memref<8x128xf32, #tpu.memory_space<vmem>>, vector<8x128xf32>
    %126 = arith.index_cast %c3_i32 : i32 to index
    %c0_50 = arith.constant 0 : index
    %c0_51 = arith.constant 0 : index
    %127 = vector.load %arg8[%126, %c0_50, %c0_51] : memref<4x8x384xf32, #tpu.memory_space<vmem>>, vector<1x8x384xf32>
    %128 = vector.shape_cast %127 : vector<1x8x384xf32> to vector<8x384xf32>
    %129 = arith.truncf %125 : vector<8x128xf32> to vector<8x128xbf16>
    %cst_52 = arith.constant dense<0.000000e+00> : vector<8x384xf32>
    %130 = tpu.matmul %129, %12, %cst_52 {dimension_numbers = #tpu.dot_dimension_numbers<[1], [0], [0], [1], [0, 0, 1, 1], [], []>} : vector<8x128xbf16>, vector<128x384xbf16>, vector<8x384xf32> -> vector<8x384xf32>
    %131 = vector.broadcast %13 : vector<1x384xf32> to vector<8x384xf32>
    %132 = arith.addf %130, %131 : vector<8x384xf32>
    %133 = vector.extract_strided_slice %128 {offsets = [0, 0], sizes = [8, 128], strides = [1, 1]} : vector<8x384xf32> to vector<8x128xf32>
    %134 = vector.extract_strided_slice %132 {offsets = [0, 0], sizes = [8, 128], strides = [1, 1]} : vector<8x384xf32> to vector<8x128xf32>
    %135 = arith.addf %133, %134 : vector<8x128xf32>
    %136 = arith.negf %135 : vector<8x128xf32>
    %137 = math.exp %136 : vector<8x128xf32>
    %cst_53 = arith.constant 1.000000e+00 : f32
    %138 = vector.broadcast %cst_53 : f32 to vector<8x128xf32>
    %139 = arith.addf %138, %137 : vector<8x128xf32>
    %140 = arith.divf %138, %139 : vector<8x128xf32>
    %141 = vector.extract_strided_slice %128 {offsets = [0, 128], sizes = [8, 128], strides = [1, 1]} : vector<8x384xf32> to vector<8x128xf32>
    %142 = vector.extract_strided_slice %132 {offsets = [0, 128], sizes = [8, 128], strides = [1, 1]} : vector<8x384xf32> to vector<8x128xf32>
    %143 = arith.addf %141, %142 : vector<8x128xf32>
    %144 = arith.negf %143 : vector<8x128xf32>
    %145 = math.exp %144 : vector<8x128xf32>
    %cst_54 = arith.constant 1.000000e+00 : f32
    %146 = vector.broadcast %cst_54 : f32 to vector<8x128xf32>
    %147 = arith.addf %146, %145 : vector<8x128xf32>
    %148 = arith.divf %146, %147 : vector<8x128xf32>
    %149 = vector.extract_strided_slice %128 {offsets = [0, 256], sizes = [8, 128], strides = [1, 1]} : vector<8x384xf32> to vector<8x128xf32>
    %150 = vector.extract_strided_slice %132 {offsets = [0, 256], sizes = [8, 128], strides = [1, 1]} : vector<8x384xf32> to vector<8x128xf32>
    %151 = arith.mulf %140, %150 : vector<8x128xf32>
    %152 = arith.addf %149, %151 : vector<8x128xf32>
    %153 = math.tanh %152 : vector<8x128xf32>
    %154 = arith.subf %125, %153 : vector<8x128xf32>
    %155 = arith.mulf %148, %154 : vector<8x128xf32>
    %156 = arith.addf %153, %155 : vector<8x128xf32>
    %c0_55 = arith.constant 0 : index
    %c0_56 = arith.constant 0 : index
    %157 = vector.load %arg7[%c0_55, %c0_56] : memref<8x128xf32, #tpu.memory_space<vmem>>, vector<8x128xf32>
    tpu.vector_store %arg7[%c0_55, %c0_56], %156 {strides = array<i32>} : memref<8x128xf32, #tpu.memory_space<vmem>>, vector<8x128xf32>,
    %158 = arith.index_cast %c3_i32 : i32 to index
    %c0_57 = arith.constant 0 : index
    %c0_58 = arith.constant 0 : index
    %159 = vector.load %arg6[%158, %c0_57, %c0_58] : memref<4x8x128xf32, #tpu.memory_space<vmem>>, vector<1x8x128xf32>
    %160 = vector.shape_cast %159 : vector<1x8x128xf32> to vector<8x128xf32>
    %161 = vector.shape_cast %156 : vector<8x128xf32> to vector<1x8x128xf32>
    tpu.vector_store %arg6[%158, %c0_57, %c0_58], %161 {strides = array<i32>} : memref<4x8x128xf32, #tpu.memory_space<vmem>>, vector<1x8x128xf32>,
    %c4_i32 = arith.constant 4 : i32
    return
  }
  func.func @transform_0(%arg0: i32) -> (i32, i32, i32) {
    %c0_i32 = arith.constant 0 : i32
    %c0_i32_0 = arith.constant 0 : i32
    %c0_i32_1 = arith.constant 0 : i32
    return %arg0, %c0_i32, %c0_i32_0 : i32, i32, i32
  }
  func.func @transform_1(%arg0: i32) -> (i32, i32) {
    %c0_i32 = arith.constant 0 : i32
    %c0_i32_0 = arith.constant 0 : i32
    %c0_i32_1 = arith.constant 0 : i32
    return %c0_i32, %c0_i32_0 : i32, i32
  }
  func.func @transform_2(%arg0: i32) -> (i32, i32) {
    %c0_i32 = arith.constant 0 : i32
    %c0_i32_0 = arith.constant 0 : i32
    %c0_i32_1 = arith.constant 0 : i32
    return %c0_i32, %c0_i32_0 : i32, i32
  }
  func.func @transform_3(%arg0: i32) -> (i32, i32) {
    %c0_i32 = arith.constant 0 : i32
    %c0_i32_0 = arith.constant 0 : i32
    %c0_i32_1 = arith.constant 0 : i32
    return %c0_i32, %c0_i32_0 : i32, i32
  }
  func.func @transform_4(%arg0: i32) -> (i32, i32) {
    %c0_i32 = arith.constant 0 : i32
    %c0_i32_0 = arith.constant 0 : i32
    %c0_i32_1 = arith.constant 0 : i32
    return %c0_i32, %c0_i32_0 : i32, i32
  }
  func.func @transform_5(%arg0: i32) -> (i32, i32, i32) {
    %c0_i32 = arith.constant 0 : i32
    %c0_i32_0 = arith.constant 0 : i32
    %c0_i32_1 = arith.constant 0 : i32
    return %arg0, %c0_i32, %c0_i32_0 : i32, i32, i32
  }
}

</mosaic_0001>

<bundles_post_ra>
// kernel: tpu_custom_call.1
= control target key start
LH: loop header
LB: loop body
LE: loop exit
PB: predicated region body
PF: predicated region fallthrough
CT: control target
= control target key end

     0   :  { %10 = vsyncpa [#allocation5], 0  ;;  %s2428_s0 = inlined_call_operand.hbm [shape: bf16[8,8,128], index: 0, kind: input, shape index: {}]   ;;  %s2429_s1 = inlined_call_operand.hbm [shape: bf16[128,384], index: 1, kind: input, shape index: {}]   ;;  %s2430_s2 = inlined_call_operand.hbm [shape: bf16[128,384], index: 2, kind: input, shape index: {}]   ;;  %s2431_s3 = inlined_call_operand.vmem [shape: f32[1,384], index: 3, kind: input, shape index: {}]   ;;  %s2432_s4 = inlined_call_operand.vmem [shape: f32[1,384], index: 4, kind: input, shape index: {}]   ;;  %s2433_s5 = inlined_call_operand.hbm [shape: f32[8,8,128], index: 5, kind: output, shape index: {}]  }
   0x1   :  { %12 = vsyncpa [#allocation5 + $0x1], 0 }
   0x2   :  { %13 = vsyncpa [#allocation8], 0 }
   0x3   :  { %14 = vsyncpa [#allocation6], 0 }
   0x4   :  { %16 = vsyncpa [#allocation6 + $0x1], 0  ;;  %s1921_s18 = smov 0   ;;  %s1923_s19 = smov 0  }
   0x5   :  { %s1925_s20 = smov 0   ;;  %s1927_s21 = smov 0  }
   0x6 LB: > { %s1942_s22 = sadd.s32 4294967295, %s1875_s21   ;;  %s1308_s23 = sadd.s32 4294967294, %s1875_s21   ;;  %s1875_s21 = sphi %s1927_s21, %s2454_s21   ;;  %s1871_s20 = sphi %s1925_s20, %s2453_s20   ;;  %s1867_s19 = sphi %s1923_s19, %s2452_s19   ;;  %s1863_s18 = sphi %s1921_s18, %s2451_s18  }
   0x7   : > { %p42_p0 = scmp.ne.s32.totalorder %s1867_s19, %s1863_s18  ;;  %p2434_p1 = scmp.eq.s32.totalorder %s1942_s22, 0 }
   0x8   : > { %p156_p3 = scmp.eq.s32.totalorder %s1308_s23, 1  ;;  %p1309_p5 = scmp.ge.s32.totalorder %s1875_s21, 1 }
   0x9   : > { %p1951_p4 = por %p2434_p1, %p42_p0  ;;  %p163_p7 = scmp.lt.s32.totalorder %s1875_s21, 3 }
   0xa   : > { %p1956_p6 = por %p156_p3, %p42_p0  ;;  %s1877_s27 = smov [#allocation7]  }
   0xb   : > { %s2437_s24 = scalar_select %p1951_p4, 1, 0 }
   0xc   : > { %s2438_s25 = scalar_select %p1956_p6, 1, 0 }
   0xd   : > { %p1962_p9 = pnand %p1309_p5, %p163_p7  ;;  %s175_s28 = sshll.u32 %s1877_s27, 4  ;;  %s1966_s28 = int_to_ptr.vmem [resolvable:$true] %s175_s28 }
   0xe   : > { %s1878_s30 = smov [#allocation9]   ;;  %s1719_s9 = scalar_lea.hbm %s2429_s1, 3072 }
   0xf   : > { %p1548_p10 = pneg %p1962_p9  ;;  %s188_s6 = sshll.u32 %s1878_s30, 4  ;;  %s1977_s6 = int_to_ptr.vmem [resolvable:$true] %s188_s6 }
  0x10   : > { %p1720_p13 = scmp.ne.s32.totalorder %s2429_s1, %s1719_s9  ;;  %p1726_p7 = scmp.lt.u32.totalorder %s1719_s9, %s2429_s1 }
  0x11   : > { %p1973_p12 = pnand %p1548_p10, %p2434_p1 }
  0x13   : > { %p1721_p0 = pneg %p1973_p12 }
  0x15   : > { %p1722_p3 = pnand %p1721_p0, %p1720_p13 }
  0x17   : > { %p1723_p5 = pneg %p1722_p3 }
  0x19   : > { %p1728_p10 = pnand %p1726_p7, %p1723_p5 }
  0x1b   : > { %1731 = shalt.err (!%p1728_p10)
}
  0x1c   : > { %s1732_s14 = scalar_lea.vmem %s1966_s28, 3072  ;;  %p1740_p2 = scmp.lt.s32.totalorder %s1966_s28, %s1966_s28 }
  0x1d   : > { %p1733_p11 = scmp.ne.s32.totalorder %s1966_s28, %s1732_s14  ;;  %p1741_p13 = scmp.lt.s32.totalorder %s1732_s14, %s1732_s14 }
  0x1f   : > { %p1735_p8 = pnand %p1733_p11, %p1721_p0  ;;  %p1742_p3 = por %p1741_p13, %p1740_p2 }
  0x21   : > { %p1736_p1 = pneg %p1735_p8 }
  0x23   : > { %p1743_p6 = pnand %p1742_p3, %p1736_p1 }
  0x25   : > { %1746 = shalt.err (!%p1743_p6)
}
  0x26   : > { %s1879_s15 = smov 192   ;;  %s1880_s16 = smov 12  }
  0x27   : > { %1551 = dma.hbm_to_vmem [thread:$0]  (!%p1973_p12), %s2429_s1, 3072, %s1966_s28, [#allocation8], %s1879_s15, %s1879_s15, %s1880_s16  }
  0x28   : > { %s1747_s7 = scalar_lea.hbm %s2430_s2, 3072 }
  0x29   : > { %p1748_p2 = scmp.ne.s32.totalorder %s2430_s2, %s1747_s7  ;;  %p1754_p8 = scmp.lt.u32.totalorder %s1747_s7, %s2430_s2 }
  0x2b   : > { %p1750_p1 = pnand %p1748_p2, %p1721_p0 }
  0x2d   : > { %p1751_p6 = pneg %p1750_p1 }
  0x2f   : > { %p1756_p11 = pnand %p1754_p8, %p1751_p6 }
  0x31   : > { %1759 = shalt.err (!%p1756_p11)
}
  0x32   : > { %s1760_s28 = scalar_lea.vmem %s1977_s6, 3072  ;;  %p1768_p13 = scmp.lt.s32.totalorder %s1977_s6, %s1977_s6 }
  0x33   : > { %p1761_p5 = scmp.ne.s32.totalorder %s1977_s6, %s1760_s28  ;;  %p1769_p3 = scmp.lt.s32.totalorder %s1760_s28, %s1760_s28 }
  0x35   : > { %p1763_p7 = pnand %p1761_p5, %p1721_p0  ;;  %p1770_p2 = por %p1769_p3, %p1768_p13 }
  0x37   : > { %p1764_p10 = pneg %p1763_p7 }
  0x39   : > { %p1771_p1 = pnand %p1770_p2, %p1764_p10 }
  0x3b   : > { %1774 = shalt.err (!%p1771_p1)
}
  0x3c   : > { %1554 = dma.hbm_to_vmem [thread:$0]  (!%p1973_p12), %s2430_s2, 3072, %s1977_s6, [#allocation8], %s1879_s15, %s1879_s15, %s1880_s16  }
  0x3d   : > { %s2032_s14 = sadd.s32 1, %s1875_s21   ;;  %s29_s29 = sadd.s32 1, %s1871_s20 }
  0x3e   : > { %s26_s17 = ssub.s32 %s1875_s21, %s2032_s14  ;;  %p36_p0 = scmp.ne.s32.totalorder %s1871_s20, %s1867_s19 }
  0x3f   : > { %p27_p6 = scmp.eq.s32.totalorder %s26_s17, 0  ;;  %p37_p8 = scmp.eq.s32.totalorder %s1875_s21, 0 }
  0x40   : > { %p2441_p11 = scmp.eq.s32.totalorder %s1942_s22, 1  ;;  %p1565_p7 = scmp.lt.s32.totalorder %s1875_s21, 2 }
  0x41   : > { %s2048_s27 = scalar_select %p27_p6, %s1871_s20, %s29_s29  }
  0x42   : > { %p2042_p5 = por %p2441_p11, %p36_p0  ;;  %p38_p10 = por %p37_p8, %p36_p0 }
  0x43   : > { %s208_s30 = sand.u32 1, %s1871_s20   ;;  %s1388_s6 = sshll.u32 %s1875_s21, 8 }
  0x44   : > { %s2442_s23 = scalar_select %p2042_p5, 1, 0 }
  0x45   : > { %s1313_s7 = sshll.u32 %s208_s30, 4  ;;  %s2055_s8 = scalar_lea.hbm %s2428_s0, %s1388_s6 }
  0x46   : > { %s212_s9 = scalar_lea.vmem [#allocation4], %s1313_s7  ;;  %p2059_p12 = pnand %p1565_p7, %p38_p10 }
  0x47   : > { %s219_s10 = sshll.u32 %s212_s9, 4  ;;  %s2063_s28 = scalar_lea.sflag [#allocation5], %s208_s30  ;;  %s2057_s10 = int_to_ptr.vmem [resolvable:$true] %s219_s10 }
  0x48   : > { %s1775_s12 = scalar_lea.hbm %s2055_s8, 256  ;;  %p1777_p3 = pneg %p2059_p12 }
  0x49   : > { %p1776_p13 = scmp.ne.s32.totalorder %s2055_s8, %s1775_s12  ;;  %s1780_s17 = scalar_lea.hbm %s2428_s0, 512 }
  0x4a   : > { %p1781_p0 = scmp.lt.u32.totalorder %s2055_s8, %s2428_s0  ;;  %p1782_p6 = scmp.lt.u32.totalorder %s1780_s17, %s1775_s12 }
  0x4b   : > { %p1778_p2 = pnand %p1777_p3, %p1776_p13  ;;  %p1784_p11 = scmp.lt.u32.totalorder %s1775_s12, %s2055_s8 }
  0x4c   : > { %p1783_p8 = por %p1782_p6, %p1781_p0 }
  0x4d   : > { %p1779_p1 = pneg %p1778_p2 }
  0x4e   : > { %p1785_p7 = por %p1784_p11, %p1783_p8 }
  0x50   : > { %p1786_p10 = pnand %p1785_p7, %p1779_p1 }
  0x52   : > { %1789 = shalt.err (!%p1786_p10)
}
  0x53   : > { %s1790_s30 = scalar_lea.vmem %s2057_s10, 256  ;;  %s1881_s15 = smov [#allocation4]  }
  0x54   : > { %p1791_p13 = scmp.ne.s32.totalorder %s2057_s10, %s1790_s30  ;;  %s1795_s16 = sshll.u32 %s1881_s15, 4  ;;  %s1796_s16 = int_to_ptr.vmem [resolvable:$false] %s1795_s16 }
  0x55   : > { %s1797_s9 = scalar_lea.vmem %s1796_s16, 512  ;;  %p1798_p4 = scmp.lt.s32.totalorder %s2057_s10, %s1796_s16 }
  0x56   : > { %p1793_p2 = pnand %p1791_p13, %p1777_p3  ;;  %p1799_p0 = scmp.lt.s32.totalorder %s1797_s9, %s1790_s30 }
  0x58   : > { %p1794_p5 = pneg %p1793_p2  ;;  %p1800_p6 = por %p1799_p0, %p1798_p4 }
  0x5a   : > { %p1801_p8 = pnand %p1800_p6, %p1794_p5 }
  0x5c   : > { %1804 = shalt.err (!%p1801_p8)
}
  0x5d   : > { %s1882_s12 = smov 64   ;;  %s1883_s13 = smov 4  }
  0x5e   : > { %1558 = dma.hbm_to_vmem [thread:$0]  (!%p2059_p12), %s2055_s8, 256, %s2057_s10, %s2063_s28, %s1882_s12, %s1882_s12, %s1883_s13  }
  0x5f   : > { %231 = sbr.rel (%p1962_p9) target bundleno = 1253 (0x4e5), region = 40  ;;  %s2094_s29 = sand.u32 (!%p1962_p9), 1, %s1867_s19  }
  0x60   : > { %s1317_s17 = sshll.u32 (!%p1962_p9), %s2094_s29, 4  ;;  %s234_s7 = scalar_lea.sflag (!%p1962_p9), [#allocation5], %s2094_s29 }
  0x61   : > { %s2098_s6 = scalar_lea.vmem (!%p1962_p9), [#allocation4], %s1317_s17  ;;  %p2444_p4 = scmp.ne.s32.totalorder (!%p1962_p9), %s2437_s24, 0 }
  0x66   : > { %1850 = dma.done.wait (%p2444_p4), %s234_s7, 256  }
  0x67   : > { %1852 = vsyncadd (%p2444_p4), %s234_s7, 4294967040  ;;  %p2445_p5 = scmp.eq.s32.totalorder %s1942_s22, 0 }
  0x69   : > { %1854 = dma.done.wait (%p2445_p5), [#allocation8], 6144   ;;  %p2446_p9 = pmov %p2445_p5 }
  0x6a   : > { %s1320_s26 = sshll.u32 %s2094_s29, 5  ;;  %p2447_p12 = scmp.ne.s32.totalorder %s1942_s22, 0 }
  0x6b   : > { %1856 = vsyncadd (%p2446_p9), [#allocation8], 4294961152  ;;  %s2109_s8 = scalar_lea.vmem [#allocation10], %s1320_s26  ;;  %v1884_v0 = vmov (!%p2447_p12), 0.0  }
  0x6c   : > { %278 = sbr.rel (%p2447_p12) target bundleno = 115 (0x73), region = 56  ;;  %279 = vst [vmem:[#allocation2] sm:$0xff] (!%p2447_p12), %v1884_v0 }
  0x73 PF: > { %v1613_v1 = vld [vmem:[#allocation7 + $0x4] ss:$12 sps:$4 sm:$0xff]   ;;  %v1615_v2 = vld [vmem:[#allocation7] ss:$12 sps:$4 sm:$0xff]   ;;  %v1885_v3 = vmov 0   ;;  %v1886_v36 = vmov 0.0   ;;  %v318_v55 = vlaneseq }
  0x74   : > { %505 = vmatprep.mubr.bf16.mxu0 %v1885_v3  ;;  %473 = vmatprep.subr.bf16.mxu0 %v1613_v1  ;;  %v1616_v4 = vld [vmem:[#allocation7 + $0x1c] ss:$12 sps:$4 sm:$0xff]   ;;  %v1618_v5 = vld [vmem:[#allocation7 + $0x18] ss:$12 sps:$4 sm:$0xff]   ;;  %v1619_v6 = vld [vmem:[#allocation7 + $0x34] ss:$12 sps:$4 sm:$0xff]  }
  0x75   : > { %474 = vmatpush1.bf16.msra.mxu0 %v1615_v2  ;;  %v1621_v7 = vld [vmem:[#allocation7 + $0x30] ss:$12 sps:$4 sm:$0xff]   ;;  %v1622_v8 = vld [vmem:[#allocation7 + $0x4c] ss:$12 sps:$4 sm:$0xff]   ;;  %v1634_v9 = vld [vmem:[#allocation7 + $0x8] ss:$12 sps:$4 sm:$0xff]  }
  0x76   : > { %475 = vmatprep.subr.bf16.mxu0 %v1616_v4  ;;  %v1624_v10 = vld [vmem:[#allocation7 + $0x48] ss:$12 sps:$4 sm:$0xff]   ;;  %v1625_v11 = vld [vmem:[#allocation7 + $0x64] ss:$12 sps:$4 sm:$0xff]   ;;  %1436 = vmatprep.subr.bf16.mxu1 %v1634_v9  ;;  %v1638_v12 = vld [vmem:[#allocation7 + $0x20] ss:$12 sps:$4 sm:$0xff]  }
  0x77   : > { %1437 = vmatpush3.bf16.msra.mxu1 %v1634_v9  ;;  %v1639_v13 = vld [vmem:[%s2098_s6] sm:$0xff]   ;;  %v1628_v16 = vld [vmem:[#allocation7 + $0x7c] ss:$12 sps:$4 sm:$0xff]   ;;  %v1635_v22 = vld [vmem:[#allocation7 + $0xac] ss:$12 sps:$4 sm:$0xff]   ;;  %vm1887_vm0 = vmmov 0  }
  0x78   : > { %1438 = vmatprep.subr.bf16.mxu1 %v1638_v12  ;;  %v1627_v14 = vld [vmem:[#allocation7 + $0x60] ss:$12 sps:$4 sm:$0xff]   ;;  %v1642_v15 = vld [vmem:[#allocation7 + $0x38] ss:$12 sps:$4 sm:$0xff]   ;;  %1452 = vmatprep.mubr.bf16.mxu1 %v1639_v13  ;;  %v1646_v17 = vld [vmem:[#allocation7 + $0x50] ss:$12 sps:$4 sm:$0xff]  }
  0x79   : > { %476 = vmatpush1.bf16.msra.mxu0 %v1618_v5  ;;  %v1630_v18 = vld [vmem:[#allocation7 + $0x78] ss:$12 sps:$4 sm:$0xff]   ;;  %v1631_v19 = vld [vmem:[#allocation7 + $0x94] ss:$12 sps:$4 sm:$0xff]   ;;  %v1633_v21 = vld [vmem:[#allocation7 + $0x90] ss:$12 sps:$4 sm:$0xff]  }
  0x7a   : > { %477 = vmatprep.subr.bf16.mxu0 %v1619_v6  ;;  %v1650_v20 = vld [vmem:[#allocation7 + $0x68] ss:$12 sps:$4 sm:$0xff]   ;;  %v1654_v23 = vld [vmem:[#allocation7 + $0x80] ss:$12 sps:$4 sm:$0xff]   ;;  %v2115_v25 = vld [vmem:[#allocation9 + $0x4] ss:$12 sps:$4 sm:$0xff]  }
  0x7b   : > { %1439 = vmatpush3.bf16.msra.mxu1 %v1638_v12  ;;  %v1637_v24 = vld [vmem:[#allocation7 + $0xa8] ss:$12 sps:$4 sm:$0xff]   ;;  %v1658_v26 = vld [vmem:[#allocation7 + $0x98] ss:$12 sps:$4 sm:$0xff]   ;;  %v2117_v27 = vld [vmem:[#allocation9] ss:$12 sps:$4 sm:$0xff]  }
  0x7c   : > { %1440 = vmatprep.subr.bf16.mxu1 %v1642_v15  ;;  %v2120_v28 = vld [vmem:[#allocation9 + $0x1c] ss:$12 sps:$4 sm:$0xff]   ;;  %v2123_v30 = vld [vmem:[#allocation9 + $0x18] ss:$12 sps:$4 sm:$0xff]   ;;  %v2127_v31 = vld [vmem:[#allocation9 + $0x34] ss:$12 sps:$4 sm:$0xff]  }
  0x7d   : > { %478 = vmatpush1.bf16.msra.mxu0 %v1621_v7  ;;  %v1663_v29 = vld [vmem:[#allocation7 + $0xb0] ss:$12 sps:$4 sm:$0xff]   ;;  %v2134_v34 = vld [vmem:[#allocation9 + $0x4c] ss:$12 sps:$4 sm:$0xff]   ;;  %v2136_v35 = vld [vmem:[#allocation9 + $0x8] ss:$12 sps:$4 sm:$0xff]  }
  0x7e   : > { %479 = vmatprep.subr.bf16.mxu0 %v1622_v8  ;;  %v1662_v32 = vld [vmem:[%s2098_s6 + $0x8] sm:$0xff]   ;;  %v2144_v38 = vld [vmem:[#allocation9 + $0x64] ss:$12 sps:$4 sm:$0xff]   ;;  %v2166_v44 = vld [vmem:[#allocation9 + $0x94] ss:$12 sps:$4 sm:$0xff]   ;;  %v319_v56 = vshrl.u32 %v318_v55, 7 }
  0x7f   : > { %1441 = vmatpush3.bf16.msra.mxu1 %v1642_v15  ;;  %v2131_v33 = vld [vmem:[#allocation9 + $0x30] ss:$12 sps:$4 sm:$0xff]   ;;  %v2140_v37 = vld [vmem:[#allocation9 + $0x48] ss:$12 sps:$4 sm:$0xff]   ;;  %v2147_v39 = vld [vmem:[#allocation9 + $0x20] ss:$12 sps:$4 sm:$0xff]  }
  0x80   : > { %1442 = vmatprep.subr.bf16.mxu1 %v1646_v17  ;;  %v2153_v40 = vld [vmem:[#allocation9 + $0x60] ss:$12 sps:$4 sm:$0xff]   ;;  %v2156_v41 = vld [vmem:[#allocation9 + $0x7c] ss:$12 sps:$4 sm:$0xff]   ;;  %v2159_v42 = vld [vmem:[#allocation9 + $0x38] ss:$12 sps:$4 sm:$0xff]  }
  0x81   : > { %480 = vmatpush1.bf16.msra.mxu0 %v1624_v10  ;;  %v2163_v43 = vld [vmem:[#allocation9 + $0x78] ss:$12 sps:$4 sm:$0xff]   ;;  %v2169_v45 = vld [vmem:[#allocation9 + $0x50] ss:$12 sps:$4 sm:$0xff]   ;;  %v2179_v48 = vld [vmem:[#allocation9 + $0x68] ss:$12 sps:$4 sm:$0xff]  }
  0x82   : > { %481 = vmatprep.subr.bf16.mxu0 %v1625_v11  ;;  %v2173_v46 = vld [vmem:[#allocation9 + $0x90] ss:$12 sps:$4 sm:$0xff]   ;;  %v2176_v47 = vld [vmem:[#allocation9 + $0xac] ss:$12 sps:$4 sm:$0xff]   ;;  %v2183_v49 = vld [vmem:[#allocation9 + $0xa8] ss:$12 sps:$4 sm:$0xff]  }
  0x83   : > { %1443 = vmatpush3.bf16.msra.mxu1 %v1646_v17  ;;  %v2185_v50 = vld [vmem:[#allocation2] sm:$0xff]  ;;  %v2189_v51 = vld [vmem:[#allocation9 + $0x80] ss:$12 sps:$4 sm:$0xff]   ;;  %v320_v57 = vsub.s32 0, %v319_v56  ;;  %v324_v59 = vsub.s32 1, %v319_v56  ;;  %v328_v4 = vsub.s32 2, %v319_v56 }
  0x84   : > { %1444 = vmatprep.subr.bf16.mxu1 %v1650_v20  ;;  %v624_v52 = vpack.c.bf16 %v2185_v50, %v2185_v50  ;;  %v2197_v53 = vld [vmem:[#allocation9 + $0x98] ss:$12 sps:$4 sm:$0xff]   ;;  %v2204_v54 = vld [vmem:[#allocation9 + $0xb0] ss:$12 sps:$4 sm:$0xff]   ;;  %s1389_s30 = sshll.u32 %s1942_s22, 9  ;;  %s1216_s15 = sshll.u32 %s2109_s8, 4  ;;  %s2383_s15 = int_to_ptr.vmem [resolvable:$true] %s1216_s15 }
  0x85   : > { %482 = vmatpush1.bf16.msra.mxu0 %v1627_v14  ;;  %v316_v58 = vld [vmem:[%s2431_s3] sm:$0x7]  ;;  %s2381_s12 = scalar_lea.hbm %s2433_s5, %s1389_s30  ;;  %s1203_s13 = scalar_lea.sflag [#allocation6], %s2094_s29 }
  0x86   : > { %483 = vmatprep.subr.bf16.mxu0 %v1628_v16  ;;  %v321_v60 = vrot.slane %v316_v58, %v320_v57  ;;  %v325_v63 = vrot.slane %v316_v58, %v324_v59  ;;  %v329_v6 = vrot.slane %v316_v58, %v328_v4  ;;  %s1805_s17 = scalar_lea.vmem %s2383_s15, 512  ;;  %p2448_p1 = scmp.ne.s32.totalorder %s2442_s23, 0 }
  0x87   : > { %1445 = vmatpush3.bf16.msra.mxu1 %v1650_v20  ;;  %p1806_p3 = scmp.ne.s32.totalorder %s2383_s15, %s1805_s17  ;;  %s1888_s22 = smov [#allocation10]  }
  0x88   : > { %1446 = vmatprep.subr.bf16.mxu1 %v1654_v23  ;;  %s1809_s7 = sshll.u32 %s1888_s22, 4  ;;  %s1810_s7 = int_to_ptr.vmem [resolvable:$false] %s1809_s7 }
  0x89   : > { %484 = vmatpush1.bf16.msra.mxu0 %v1630_v18  ;;  %p1807_p11 = pnand %p1806_p3, %p2448_p1  ;;  %s1811_s6 = scalar_lea.vmem %s1810_s7, 1024 }
  0x8a   : > { %485 = vmatprep.subr.bf16.mxu0 %v1631_v19  ;;  %p1812_p10 = scmp.lt.s32.totalorder %s2383_s15, %s1810_s7  ;;  %p1813_p13 = scmp.lt.s32.totalorder %s1811_s6, %s1805_s17 }
  0x8b   : > { %1447 = vmatpush3.bf16.msra.mxu1 %v1654_v23  ;;  %p1808_p7 = pneg %p1807_p11 }
  0x8c   : > { %1448 = vmatprep.subr.bf16.mxu1 %v1658_v26  ;;  %p1814_p2 = por %p1813_p13, %p1812_p10 }
  0x8d   : > { %486 = vmatpush1.bf16.msra.mxu0 %v1633_v21 }
  0x8e   : > { %487 = vmatprep.subr.bf16.mxu0 %v1635_v22  ;;  %v619_v22 = vld [vmem:[%s2432_s4] sm:$0x7]  ;;  %p1815_p0 = pnand %p1814_p2, %p1808_p7 }
  0x8f   : > { %1449 = vmatpush3.bf16.msra.mxu1 %v1658_v26  ;;  %v2265_v23 = vrot.slane %v619_v22, %v320_v57 }
  0x90   : > { %1450 = vmatprep.subr.bf16.mxu1 %v1663_v29 }
  0x91   : > { %488 = vmatpush1.bf16.msra.mxu0 %v1637_v24  ;;  %v2267_v24 = vrot.slane %v619_v22, %v324_v59 }
  0x92   : > { %769 = vmatprep.subr.bf16.mxu0 %v2115_v25 }
  0x93   : > { %1451 = vmatpush3.bf16.msra.mxu1 %v1663_v29 }
  0x94   : > { %506 = vmatmul.mubr.bf16.vlgmr.msra.gmra.mrb[0].mxu0 %v1639_v13  ;;  %1456 = vmatprep.subr.bf16.mxu1 %v1886_v36 }
  0x95   : > { %770 = vmatpush1.bf16.msra.mxu0 %v2117_v27  ;;  %515 = vmatprep.mubr.bf16.mxu0 %v1885_v3 }
  0x96   : > { %771 = vmatprep.subr.bf16.mxu0 %v2120_v28  ;;  %1453 = vmatmul.mubr.bf16.vlgmr.msra.gmra.mrb[0].mxu1 %v1662_v32 }
  0x97   : > { %1457 = vmatpush3.bf16.msra.mxu1 %v2136_v35  ;;  %1472 = vmatprep.mubr.msk.bf16.mxu1 %vm1887_vm0, %v1886_v36 }
  0x98   : > { %1458 = vmatprep.subr.bf16.mxu1 %v1886_v36 }
  0x99   : > { %772 = vmatpush1.bf16.msra.mxu0 %v2123_v30 }
  0x9a   : > { %773 = vmatprep.subr.bf16.mxu0 %v2127_v31 }
  0x9b   : > { %1459 = vmatpush3.bf16.msra.mxu1 %v2147_v39 }
  0x9c   : > { %516 = vmatmul.mubr.bf16.gmra.mrb[4].mxu0 %v1662_v32  ;;  %1460 = vmatprep.subr.bf16.mxu1 %v1886_v36 }
  0x9d   : > { %774 = vmatpush1.bf16.msra.mxu0 %v2131_v33  ;;  %801 = vmatprep.mubr.bf16.mxu0 %v1885_v3 }
  0x9e   : > { %775 = vmatprep.subr.bf16.mxu0 %v2134_v34 }
  0x9f   : > { %1461 = vmatpush3.bf16.msra.mxu1 %v2159_v42 }
  0xa0   : > { %1462 = vmatprep.subr.bf16.mxu1 %v1886_v36 }
  0xa1   : > { %776 = vmatpush1.bf16.msra.mxu0 %v2140_v37 }
  0xa2   : > { %777 = vmatprep.subr.bf16.mxu0 %v2144_v38 }
  0xa3   : > { %1463 = vmatpush3.bf16.msra.mxu1 %v2169_v45 }
  0xa4   : > { %1464 = vmatprep.subr.bf16.mxu1 %v1886_v36 }
  0xa5   : > { %778 = vmatpush1.bf16.msra.mxu0 %v2153_v40 }
  0xa6   : > { %779 = vmatprep.subr.bf16.mxu0 %v2156_v41 }
  0xa7   : > { %1465 = vmatpush3.bf16.msra.mxu1 %v2179_v48 }
  0xa8   : > { %1466 = vmatprep.subr.bf16.mxu1 %v1886_v36 }
  0xa9   : > { %780 = vmatpush1.bf16.msra.mxu0 %v2163_v43 }
  0xaa   : > { %781 = vmatprep.subr.bf16.mxu0 %v2166_v44 }
  0xab   : > { %1467 = vmatpush3.bf16.msra.mxu1 %v2189_v51 }
  0xac   : > { %1468 = vmatprep.subr.bf16.mxu1 %v1886_v36 }
  0xad   : > { %782 = vmatpush1.bf16.msra.mxu0 %v2173_v46 }
  0xae   : > { %783 = vmatprep.subr.bf16.mxu0 %v2176_v47 }
  0xaf   : > { %1469 = vmatpush3.bf16.msra.mxu1 %v2197_v53 }
  0xb0   : > { %1470 = vmatprep.subr.bf16.mxu1 %v1886_v36 }
  0xb1   : > { %784 = vmatpush1.bf16.msra.mxu0 %v2183_v49 }
  0xb2   : > { %878 = vmatprep.subr.bf16.mxu0 %v2115_v25 }
  0xb3   : > { %1471 = vmatpush3.bf16.msra.mxu1 %v2204_v54 }
  0xb4   : > { %802 = vmatmul.mubr.bf16.vlgmr.msra.gmra.mrb[8].mxu0 %v624_v52  ;;  %1476 = vmatprep.subr.bf16.mxu1 %v1886_v36 }
  0xb5   : > { %879 = vmatpush1.bf16.msra.mxu0 %v2117_v27  ;;  %910 = vmatprep.mubr.bf16.mxu0 %v1885_v3 }
  0xb6   : > { %880 = vmatprep.subr.bf16.mxu0 %v2120_v28  ;;  %1473 = vmatmul.mubr.bf16.vlgmr.msra.gmra.mrb[4].mxu1 %v624_v52 }
  0xb7   : > { %1477 = vmatpush3.bf16.msra.mxu1 %v2136_v35  ;;  %1492 = vmatprep.mubr.msk.bf16.mxu1 %vm1887_vm0, %v1886_v36 }
  0xb8   : > { %1478 = vmatprep.subr.bf16.mxu1 %v1886_v36 }
  0xb9   : > { %881 = vmatpush1.bf16.msra.mxu0 %v2123_v30 }
  0xba   : > { %882 = vmatprep.subr.bf16.mxu0 %v2127_v31 }
  0xbb   : > { %1479 = vmatpush3.bf16.msra.mxu1 %v2147_v39 }
  0xbc   : > { %1480 = vmatprep.subr.bf16.mxu1 %v1886_v36 }
  0xbd   : > { %883 = vmatpush1.bf16.msra.mxu0 %v2131_v33 }
  0xbe   : > { %884 = vmatprep.subr.bf16.mxu0 %v2134_v34 }
  0xbf   : > { %1481 = vmatpush3.bf16.msra.mxu1 %v2159_v42 }
  0xc0   : > { %1482 = vmatprep.subr.bf16.mxu1 %v1886_v36 }
  0xc1   : > { %885 = vmatpush1.bf16.msra.mxu0 %v2140_v37 }
  0xc2   : > { %886 = vmatprep.subr.bf16.mxu0 %v2144_v38 }
  0xc3   : > { %1483 = vmatpush3.bf16.msra.mxu1 %v2169_v45 }
  0xc4   : > { %1484 = vmatprep.subr.bf16.mxu1 %v1886_v36 }
  0xc5   : > { %887 = vmatpush1.bf16.msra.mxu0 %v2153_v40 }
  0xc6   : > { %888 = vmatprep.subr.bf16.mxu0 %v2156_v41 }
  0xc7   : > { %1485 = vmatpush3.bf16.msra.mxu1 %v2179_v48 }
  0xc8   : > { %1486 = vmatprep.subr.bf16.mxu1 %v1886_v36 }
  0xc9   : > { %889 = vmatpush1.bf16.msra.mxu0 %v2163_v43 }
  0xca   : > { %890 = vmatprep.subr.bf16.mxu0 %v2166_v44 }
  0xcb   : > { %1487 = vmatpush3.bf16.msra.mxu1 %v2189_v51 }
  0xcc   : > { %1488 = vmatprep.subr.bf16.mxu1 %v1886_v36 }
  0xcd   : > { %891 = vmatpush1.bf16.msra.mxu0 %v2173_v46 }
  0xce   : > { %892 = vmatprep.subr.bf16.mxu0 %v2176_v47 }
  0xcf   : > { %1489 = vmatpush3.bf16.msra.mxu1 %v2197_v53 }
  0xd0   : > { %1490 = vmatprep.subr.bf16.mxu1 %v1886_v36 }
  0xd1   : > { %893 = vmatpush1.bf16.msra.mxu0 %v2183_v49 }
  0xd2   : > { %988 = vmatprep.subr.bf16.mxu0 %v2115_v25 }
  0xd3   : > { %1491 = vmatpush3.bf16.msra.mxu1 %v2204_v54 }
  0xd4   : > { %1496 = vmatprep.subr.bf16.mxu1 %v1886_v36 }
 0x167   : > { %v507_v61 = vpop.f32.mrb[0].mxu0 }
 0x168   : > { %v509_v62 = vpop.f32.mrb[1].mxu0  ;;  %v508_v29 = vadd.f32 %v507_v61, %v321_v60 }
 0x169   : > { %v511_v0 = vpop.f32.mrb[2].mxu0  ;;  %v1454_v12 = vpop.f32.mrb[0].mxu1  ;;  %v510_v55 = vadd.f32 %v509_v62, %v325_v63 }
 0x16a   : > { %v2244_v1 = vadd.f32 %v511_v0, %v321_v60  ;;  %v513_v2 = vpop.f32.mrb[3].mxu0  ;;  %v2254_v15 = vadd.f32 %v1454_v12, %v329_v6  ;;  %v560_v16 = vpop.f32.mrb[1].mxu1 }
 0x16b   : > { %v2246_v5 = vadd.f32 %v513_v2, %v325_v63  ;;  %v1455_v18 = vpop.f32.mrb[2].mxu1 }
 0x16c   : > { %v2258_v19 = vadd.f32 %v1455_v18, %v329_v6  ;;  %v563_v20 = vpop.f32.mrb[3].mxu1 }
 0x16d   : > { %v2260_v21 = vadd.f32 %v563_v20, %v329_v6 }
 0x16f   : > { %v517_v7 = vpop.f32.mrb[4].mxu0 }
 0x170   : > { %v2248_v8 = vadd.f32 %v517_v7, %v321_v60  ;;  %v519_v9 = vpop.f32.mrb[5].mxu0 }
 0x171   : > { %v2250_v10 = vadd.f32 %v519_v9, %v325_v63  ;;  %v521_v11 = vpop.f32.mrb[6].mxu0 }
 0x172   : > { %v2252_v13 = vadd.f32 %v521_v11, %v321_v60  ;;  %v523_v14 = vpop.f32.mrb[7].mxu0  ;;  %v2271_v60 = vrot.slane %v619_v22, %v328_v4 }
 0x173   : > { %v2256_v17 = vadd.f32 %v523_v14, %v325_v63 }
 0x187   : > { %v803_v26 = vpop.f32.mrb[8].mxu0 }
 0x188   : > { %v804_v32 = vadd.f32 %v803_v26, %v2265_v23  ;;  %v805_v52 = vpop.f32.mrb[9].mxu0  ;;  %v561_v26 = vadd.f32 %v560_v16, %v329_v6 }
 0x189   : > { %v806_v56 = vadd.f32 %v805_v52, %v2267_v24  ;;  %v807_v58 = vpop.f32.mrb[10].mxu0  ;;  %v844_v11 = vpop.f32.mrb[4].mxu1 }
 0x18a   : > { %v850_v0 = vadd.f32 %v804_v32, %v508_v29  ;;  %v808_v2 = vpop.f32.mrb[11].mxu0  ;;  %v1474_v12 = vpop.f32.mrb[5].mxu1  ;;  %v845_v61 = vadd.f32 %v844_v11, %v2271_v60 }
 0x18b   : > { %v857_v7 = vadd.f32 %v806_v56, %v510_v55  ;;  %v847_v57 = vpop.f32.mrb[6].mxu1 }
 0x18c   : > { %v1372_v9 = vmul.f32 -1.442695, %v850_v0  ;;  %v1475_v14 = vpop.f32.mrb[7].mxu1 }
 0x18d   : > { %v1373_v59 = vmul.f32 -1.442695, %v857_v7 }
 0x18e   : > { %1679 = vpow2.f32 %v1372_v9 }
 0x18f   : > { %1681 = vpow2.f32 %v1373_v59 }
 0x198   : > { %v1680_v18 = vpop.eup %1679 }
 0x199   : > { %v854_v20 = vadd.f32 1.0, %v1680_v18  ;;  %v1682_v62 = vpop.eup %1681 }
 0x19a   : > { %v861_v32 = vadd.f32 1.0, %v1682_v62 }
 0x19b   : > { %1683 = vrcp.f32 %v854_v20 }
 0x1a5   : > { %v1684_v63 = vpop.eup %1683 }
 0x1a6   : > { %v864_v29 = vmul.f32 %v1684_v63, %v845_v61 }
 0x1a8   : > { %v865_v52 = vadd.f32 %v864_v29, %v561_v26 }
 0x1aa   : > { %1685 = vtanh.f32 %v865_v52 }
 0x1ab   : > { %1687 = vrcp.f32 %v861_v32 }
 0x1b4   : > { %v1686_v55 = vpop.eup %1685 }
 0x1b5   : > { %v867_v56 = vsub.f32 %v2185_v50, %v1686_v55  ;;  %v1688_v58 = vpop.eup %1687 }
 0x1b7   : > { %v868_v0 = vmul.f32 %v1688_v58, %v867_v56 }
 0x1b9   : > { %v2275_v2 = vadd.f32 %v1686_v55, %v868_v0 }
 0x1bb   : > { %871 = vst [vmem:[%s2109_s8] sm:$0xff] %v2275_v2  ;;  %v877_v4 = vpack.c.bf16 %v2275_v2, %v2275_v2 }
 0x1bd   : > { %911 = vmatmul.mubr.bf16.vlgmr.msra.gmra.mrb[12].mxu0 %v877_v4  ;;  %1493 = vmatmul.mubr.bf16.vlgmr.msra.gmra.mrb[8].mxu1 %v877_v4 }
 0x1be   : > { %989 = vmatpush1.bf16.msra.mxu0 %v2117_v27  ;;  %1497 = vmatpush3.bf16.msra.mxu1 %v2136_v35 }
 0x1bf   : > { %990 = vmatprep.subr.bf16.mxu0 %v2120_v28  ;;  %1498 = vmatprep.subr.bf16.mxu1 %v1886_v36 }
 0x1c0   : > { %1020 = vmatprep.mubr.bf16.mxu0 %v1885_v3  ;;  %1512 = vmatprep.mubr.msk.bf16.mxu1 %vm1887_vm0, %v1886_v36 }
 0x1c2   : > { %991 = vmatpush1.bf16.msra.mxu0 %v2123_v30  ;;  %1499 = vmatpush3.bf16.msra.mxu1 %v2147_v39 }
 0x1c3   : > { %992 = vmatprep.subr.bf16.mxu0 %v2127_v31  ;;  %1500 = vmatprep.subr.bf16.mxu1 %v1886_v36 }
 0x1c6   : > { %993 = vmatpush1.bf16.msra.mxu0 %v2131_v33  ;;  %1501 = vmatpush3.bf16.msra.mxu1 %v2159_v42 }
 0x1c7   : > { %994 = vmatprep.subr.bf16.mxu0 %v2134_v34  ;;  %1502 = vmatprep.subr.bf16.mxu1 %v1886_v36 }
 0x1ca   : > { %995 = vmatpush1.bf16.msra.mxu0 %v2140_v37  ;;  %1503 = vmatpush3.bf16.msra.mxu1 %v2169_v45 }
 0x1cb   : > { %996 = vmatprep.subr.bf16.mxu0 %v2144_v38  ;;  %1504 = vmatprep.subr.bf16.mxu1 %v1886_v36 }
 0x1ce   : > { %997 = vmatpush1.bf16.msra.mxu0 %v2153_v40  ;;  %1505 = vmatpush3.bf16.msra.mxu1 %v2179_v48 }
 0x1cf   : > { %998 = vmatprep.subr.bf16.mxu0 %v2156_v41  ;;  %1506 = vmatprep.subr.bf16.mxu1 %v1886_v36 }
 0x1d2   : > { %999 = vmatpush1.bf16.msra.mxu0 %v2163_v43  ;;  %1507 = vmatpush3.bf16.msra.mxu1 %v2189_v51 }
 0x1d3   : > { %1000 = vmatprep.subr.bf16.mxu0 %v2166_v44  ;;  %1508 = vmatprep.subr.bf16.mxu1 %v1886_v36 }
 0x1d6   : > { %1001 = vmatpush1.bf16.msra.mxu0 %v2173_v46  ;;  %1509 = vmatpush3.bf16.msra.mxu1 %v2197_v53 }
 0x1d7   : > { %1002 = vmatprep.subr.bf16.mxu0 %v2176_v47  ;;  %1510 = vmatprep.subr.bf16.mxu1 %v1886_v36 }
 0x1da   : > { %1003 = vmatpush1.bf16.msra.mxu0 %v2183_v49  ;;  %1511 = vmatpush3.bf16.msra.mxu1 %v2204_v54 }
 0x1db   : > { %1098 = vmatprep.subr.bf16.mxu0 %v2115_v25  ;;  %1516 = vmatprep.subr.bf16.mxu1 %v1886_v36 }
 0x290   : > { %v912_v50 = vpop.f32.mrb[12].mxu0  ;;  %v953_v6 = vpop.f32.mrb[8].mxu1 }
 0x291   : > { %v913_v16 = vadd.f32 %v912_v50, %v2265_v23  ;;  %v914_v22 = vpop.f32.mrb[13].mxu0  ;;  %v1494_v7 = vpop.f32.mrb[9].mxu1  ;;  %v954_v26 = vadd.f32 %v953_v6, %v2271_v60 }
 0x292   : > { %v915_v9 = vadd.f32 %v914_v22, %v2267_v24  ;;  %v916_v11 = vpop.f32.mrb[14].mxu0  ;;  %v956_v12 = vpop.f32.mrb[10].mxu1 }
 0x293   : > { %v959_v57 = vadd.f32 %v913_v16, %v2244_v1  ;;  %v917_v14 = vpop.f32.mrb[15].mxu0  ;;  %v1495_v59 = vpop.f32.mrb[11].mxu1 }
 0x294   : > { %v966_v18 = vadd.f32 %v915_v9, %v2246_v5 }
 0x295   : > { %v1374_v20 = vmul.f32 -1.442695, %v959_v57 }
 0x296   : > { %v1375_v25 = vmul.f32 -1.442695, %v966_v18 }
 0x297   : > { %1689 = vpow2.f32 %v1374_v20 }
 0x298   : > { %1691 = vpow2.f32 %v1375_v25 }
 0x2a1   : > { %v1690_v61 = vpop.eup %1689 }
 0x2a2   : > { %v963_v62 = vadd.f32 1.0, %v1690_v61  ;;  %v1692_v63 = vpop.eup %1691 }
 0x2a3   : > { %v970_v1 = vadd.f32 1.0, %v1692_v63 }
 0x2a4   : > { %1693 = vrcp.f32 %v963_v62 }
 0x2ae   : > { %v1694_v29 = vpop.eup %1693 }
 0x2af   : > { %v973_v32 = vmul.f32 %v1694_v29, %v954_v26 }
 0x2b1   : > { %v974_v52 = vadd.f32 %v973_v32, %v2260_v21 }
 0x2b3   : > { %1695 = vtanh.f32 %v974_v52 }
 0x2b4   : > { %1697 = vrcp.f32 %v970_v1 }
 0x2bd   : > { %v1696_v55 = vpop.eup %1695 }
 0x2be   : > { %v976_v5 = vsub.f32 %v2275_v2, %v1696_v55  ;;  %v1698_v56 = vpop.eup %1697 }
 0x2c0   : > { %v977_v58 = vmul.f32 %v1698_v56, %v976_v5 }
 0x2c2   : > { %v2323_v0 = vadd.f32 %v1696_v55, %v977_v58 }
 0x2c4   : > { %1376 = vst [vmem:[%s2109_s8 + $0x8] sm:$0xff] %v2323_v0  ;;  %v987_v4 = vpack.c.bf16 %v2323_v0, %v2323_v0 }
 0x2c6   : > { %1021 = vmatmul.mubr.bf16.vlgmr.msra.gmra.mrb[16].mxu0 %v987_v4  ;;  %1513 = vmatmul.mubr.bf16.vlgmr.msra.gmra.mrb[12].mxu1 %v987_v4 }
 0x2c7   : > { %1099 = vmatpush1.bf16.msra.mxu0 %v2117_v27  ;;  %1517 = vmatpush3.bf16.msra.mxu1 %v2136_v35 }
 0x2c8   : > { %1100 = vmatprep.subr.bf16.mxu0 %v2120_v28  ;;  %1518 = vmatprep.subr.bf16.mxu1 %v1886_v36 }
 0x2c9   : > { %1130 = vmatprep.mubr.bf16.mxu0 %v1885_v3  ;;  %1532 = vmatprep.mubr.msk.bf16.mxu1 %vm1887_vm0, %v1886_v36 }
 0x2cb   : > { %1101 = vmatpush1.bf16.msra.mxu0 %v2123_v30  ;;  %1519 = vmatpush3.bf16.msra.mxu1 %v2147_v39 }
 0x2cc   : > { %1102 = vmatprep.subr.bf16.mxu0 %v2127_v31  ;;  %1520 = vmatprep.subr.bf16.mxu1 %v1886_v36 }
 0x2cf   : > { %1103 = vmatpush1.bf16.msra.mxu0 %v2131_v33  ;;  %1521 = vmatpush3.bf16.msra.mxu1 %v2159_v42 }
 0x2d0   : > { %1104 = vmatprep.subr.bf16.mxu0 %v2134_v34  ;;  %1522 = vmatprep.subr.bf16.mxu1 %v1886_v36 }
 0x2d3   : > { %1105 = vmatpush1.bf16.msra.mxu0 %v2140_v37  ;;  %1523 = vmatpush3.bf16.msra.mxu1 %v2169_v45 }
 0x2d4   : > { %1106 = vmatprep.subr.bf16.mxu0 %v2144_v38  ;;  %1524 = vmatprep.subr.bf16.mxu1 %v1886_v36 }
 0x2d7   : > { %1107 = vmatpush1.bf16.msra.mxu0 %v2153_v40  ;;  %1525 = vmatpush3.bf16.msra.mxu1 %v2179_v48 }
 0x2d8   : > { %1108 = vmatprep.subr.bf16.mxu0 %v2156_v41  ;;  %1526 = vmatprep.subr.bf16.mxu1 %v1886_v36 }
 0x2db   : > { %1109 = vmatpush1.bf16.msra.mxu0 %v2163_v43  ;;  %1527 = vmatpush3.bf16.msra.mxu1 %v2189_v51 }
 0x2dc   : > { %1110 = vmatprep.subr.bf16.mxu0 %v2166_v44  ;;  %1528 = vmatprep.subr.bf16.mxu1 %v1886_v36 }
 0x2df   : > { %1111 = vmatpush1.bf16.msra.mxu0 %v2173_v46  ;;  %1529 = vmatpush3.bf16.msra.mxu1 %v2197_v53 }
 0x2e0   : > { %1112 = vmatprep.subr.bf16.mxu0 %v2176_v47  ;;  %1530 = vmatprep.subr.bf16.mxu1 %v1886_v36 }
 0x2e3   : > { %1113 = vmatpush1.bf16.msra.mxu0 %v2183_v49  ;;  %1531 = vmatpush3.bf16.msra.mxu1 %v2204_v54 }
 0x399   : > { %v1022_v3 = vpop.f32.mrb[16].mxu0  ;;  %v1063_v27 = vpop.f32.mrb[12].mxu1 }
 0x39a   : > { %v1023_v28 = vadd.f32 %v1022_v3, %v2265_v23  ;;  %v1024_v30 = vpop.f32.mrb[17].mxu0  ;;  %v1514_v31 = vpop.f32.mrb[13].mxu1  ;;  %v1064_v45 = vadd.f32 %v1063_v27, %v2271_v60 }
 0x39b   : > { %v1025_v33 = vadd.f32 %v1024_v30, %v2267_v24  ;;  %v1026_v34 = vpop.f32.mrb[18].mxu0  ;;  %v1066_v35 = vpop.f32.mrb[14].mxu1 }
 0x39c   : > { %v1069_v37 = vadd.f32 %v1023_v28, %v2248_v8  ;;  %v1027_v38 = vpop.f32.mrb[19].mxu0  ;;  %v1515_v39 = vpop.f32.mrb[15].mxu1 }
 0x39d   : > { %v1076_v36 = vadd.f32 %v1025_v33, %v2250_v10 }
 0x39e   : > { %v1377_v40 = vmul.f32 -1.442695, %v1069_v37 }
 0x39f   : > { %v1378_v41 = vmul.f32 -1.442695, %v1076_v36 }
 0x3a0   : > { %1699 = vpow2.f32 %v1377_v40 }
 0x3a1   : > { %1701 = vpow2.f32 %v1378_v41 }
 0x3aa   : > { %v1700_v42 = vpop.eup %1699 }
 0x3ab   : > { %v1073_v43 = vadd.f32 1.0, %v1700_v42  ;;  %v1702_v44 = vpop.eup %1701 }
 0x3ac   : > { %v1080_v49 = vadd.f32 1.0, %v1702_v44 }
 0x3ad   : > { %1703 = vrcp.f32 %v1073_v43 }
 0x3b7   : > { %v1704_v46 = vpop.eup %1703 }
 0x3b8   : > { %v1083_v47 = vmul.f32 %v1704_v46, %v1064_v45 }
 0x3ba   : > { %v1084_v48 = vadd.f32 %v1083_v47, %v2254_v15 }
 0x3bc   : > { %1705 = vtanh.f32 %v1084_v48 }
 0x3bd   : > { %1707 = vrcp.f32 %v1080_v49 }
 0x3c6   : > { %v1706_v51 = vpop.eup %1705 }
 0x3c7   : > { %v1086_v53 = vsub.f32 %v2323_v0, %v1706_v51  ;;  %v1708_v54 = vpop.eup %1707 }
 0x3c9   : > { %v1087_v8 = vmul.f32 %v1708_v54, %v1086_v53 }
 0x3cb   : > { %v1088_v10 = vadd.f32 %v1706_v51, %v1087_v8 }
 0x3cd   : > { %1379 = vst [vmem:[%s2109_s8 + $0x10] sm:$0xff] %v1088_v10  ;;  %v1097_v21 = vpack.c.bf16 %v1088_v10, %v1088_v10 }
 0x3cf   : > { %1131 = vmatmul.mubr.bf16.vlgmr.msra.gmra.mrb[20].mxu0 %v1097_v21  ;;  %1533 = vmatmul.mubr.bf16.vlgmr.msra.gmra.mrb[16].mxu1 %v1097_v21 }
 0x4a2   : > { %v1132_v2 = vpop.f32.mrb[20].mxu0  ;;  %v1173_v50 = vpop.f32.mrb[16].mxu1 }
 0x4a3   : > { %v1133_v6 = vadd.f32 %v1132_v2, %v2265_v23  ;;  %v1134_v16 = vpop.f32.mrb[21].mxu0  ;;  %v1534_v22 = vpop.f32.mrb[17].mxu1 }
 0x4a4   : > { %v1135_v15 = vadd.f32 %v1134_v16, %v2267_v24  ;;  %v1136_v7 = vpop.f32.mrb[22].mxu0  ;;  %v1176_v9 = vpop.f32.mrb[18].mxu1  ;;  %v1174_v24 = vadd.f32 %v1173_v50, %v2271_v60 }
 0x4a5   : > { %v1179_v11 = vadd.f32 %v1133_v6, %v2252_v13  ;;  %v1137_v12 = vpop.f32.mrb[23].mxu0  ;;  %v1535_v57 = vpop.f32.mrb[19].mxu1 }
 0x4a6   : > { %v1186_v14 = vadd.f32 %v1135_v15, %v2256_v17 }
 0x4a7   : > { %v1380_v59 = vmul.f32 -1.442695, %v1179_v11 }
 0x4a8   : > { %v1381_v18 = vmul.f32 -1.442695, %v1186_v14 }
 0x4a9   : > { %1709 = vpow2.f32 %v1380_v59 }
 0x4aa   : > { %1711 = vpow2.f32 %v1381_v18 }
 0x4b3   : > { %v1710_v20 = vpop.eup %1709 }
 0x4b4   : > { %v1183_v25 = vadd.f32 1.0, %v1710_v20  ;;  %v1712_v23 = vpop.eup %1711 }
 0x4b5   : > { %v1190_v63 = vadd.f32 1.0, %v1712_v23 }
 0x4b6   : > { %1713 = vrcp.f32 %v1183_v25 }
 0x4c0   : > { %v1714_v61 = vpop.eup %1713 }
 0x4c1   : > { %v1193_v62 = vmul.f32 %v1714_v61, %v1174_v24 }
 0x4c3   : > { %v1194_v13 = vadd.f32 %v1193_v62, %v2258_v19 }
 0x4c5   : > { %1715 = vtanh.f32 %v1194_v13 }
 0x4c6   : > { %1717 = vrcp.f32 %v1190_v63 }
 0x4cf   : > { %v1716_v17 = vpop.eup %1715 }
 0x4d0   : > { %v1196_v26 = vsub.f32 %v1088_v10, %v1716_v17  ;;  %v1718_v29 = vpop.eup %1717 }
 0x4d2   : > { %v1197_v32 = vmul.f32 %v1718_v29, %v1196_v26 }
 0x4d4   : > { %v1198_v19 = vadd.f32 %v1716_v17, %v1197_v32 }
 0x4d6   : > { %1199 = vst [vmem:[#allocation2] sm:$0xff] %v1198_v19  ;;  %1382 = vst [vmem:[%s2109_s8 + $0x18] sm:$0xff] %v1198_v19 }
 0x4d7   : > { %1818 = shalt.err (!%p1815_p0)
}
 0x4d8   : > { %s1819_s26 = scalar_lea.hbm %s2381_s12, 512  ;;  %s1823_s10 = scalar_lea.hbm %s2433_s5, 1024 }
 0x4d9   : > { %p1820_p6 = scmp.ne.s32.totalorder %s2381_s12, %s1819_s26  ;;  %p1824_p5 = scmp.lt.u32.totalorder %s2381_s12, %s2433_s5 }
 0x4da   : > { %p1825_p9 = scmp.lt.u32.totalorder %s1823_s10, %s1819_s26  ;;  %p1827_p3 = scmp.lt.u32.totalorder %s1819_s26, %s2381_s12 }
 0x4db   : > { %p1821_p8 = pnand %p1820_p6, %p2448_p1 }
 0x4dc   : > { %p1826_p12 = por %p1825_p9, %p1824_p5 }
 0x4dd   : > { %p1822_p4 = pneg %p1821_p8 }
 0x4de   : > { %p1828_p11 = por %p1827_p3, %p1826_p12 }
 0x4e0   : > { %p1829_p7 = pnand %p1828_p11, %p1822_p4 }
 0x4e2   : > { %1832 = shalt.err (!%p1829_p7)
}
 0x4e3   : > { %s1889_s30 = smov 128   ;;  %s1890_s16 = smov 8  }
 0x4e4   : > { %1546 = dma.vmem_to_hbm [thread:$0]  (%p2448_p1), %s2383_s15, 512, %s2381_s12, %s1203_s13, %s1889_s30, %s1889_s30, %s1890_s16  }
 0x4e5 PF: > { %s1231_s9 = sand.u32 1, %s1863_s18   ;;  %p2449_p10 = scmp.ne.s32.totalorder %s2438_s25, 0 }
 0x4e6   : > { %p2450_p13 = scmp.ge.s32.totalorder %s1875_s21, 2  ;;  %s1232_s17 = scalar_lea.sflag [#allocation6], %s1231_s9 }
 0x4e8   : > { %p1560_p2 = pnand %p2450_p13, %p2449_p10 }
 0x4ea   : > { %1858 = dma.done.wait (!%p1560_p2), %s1232_s17, 512  }
 0x4eb   : > { %1860 = vsyncadd (!%p1560_p2), %s1232_s17, 4294966784  ;;  %p19_p0 = scmp.ge.s32.totalorder %s2032_s14, 4   ;;  %s2451_s18 = smov %s1867_s19 }
 0x4ec   : > { %s2452_s19 = smov %s1871_s20  ;;  %s2453_s20 = smov %s2048_s27 }
 0x4ed   : > { %s2454_s21 = smov %s2032_s14  ;;  %21 = sbr.rel (!%p19_p0) target bundleno = 6 (0x6), region = 103 }
 0x4f4   :  { %1237 = vsyncpa [#allocation5], 1 }
 0x4f5   :  { %1239 = vsyncpa [#allocation5 + $0x1], 1 }
 0x4f6   :  { %1240 = vsyncpa [#allocation8], 1 }
 0x4f7   :  { %1241 = vsyncpa [#allocation6], 1 }
 0x4f8   :  { %1243 = vsyncpa [#allocation6 + $0x1], 1 }

</bundles_post_ra>
